<compile_context>
chip_gen: v7x
topology: tpu7x:2x2x1
jax: 0.10.0
libtpu: 0.0.40
codegen_flags: <defaults>
</compile_context>

<pallas_src>
import functools

import jax
import jax.numpy as jnp
import numpy as np
from jax import lax
from jax.experimental import pallas as pl
from jax.experimental.pallas import tpu as pltpu


# ----------------------------------------------------------------------------
# Main forward kernel: grouped 3x3 conv (9 rolled-tap matmuls) -> transform
# multiply -> per-image spatial mean, for NB images packed on the lane axis.
# ----------------------------------------------------------------------------
def _make_fwd_kernel(C, H, W, NB):
    HW = H * W
    N = NB * HW
    taps = [(dy, dx) for dy in (-1, 0, 1) for dx in (-1, 0, 1)]  # t == ky*3 + kx

    def kernel(x_ref, w_ref, tw_ref, bf_ref, out_ref):
        # x_ref : (C, NB*HW)  channel-major input, NB whole images packed on lanes
        # w_ref : (9, C, C)   per-tap block-diagonal conv weight
        # tw_ref: (C, NB*HW)  OrthorTransform weight tiled over the NB images
        # bf_ref: (C, 1)      conv_bias * mean(tw) per channel (bias folded)
        # out_ref: (1, C, NB) per-image channel means for this image block
        x = x_ref[...]

        # Local spatial coordinates of every lane (identical for each packed image).
        lane = lax.broadcasted_iota(jnp.int32, (C, N), 1)
        s = lane % HW
        yy = s // W
        xx = s % W

        # Grouped 3x3 conv, padding=1: accumulate 9 shifted-tap matmuls.
        # Lane rolls wrap across row/image boundaries, but every wrapped position
        # is exactly an out-of-bounds tap and gets masked to zero.
        feat = jnp.zeros((C, N), jnp.float32)
        for t, (dy, dx) in enumerate(taps):
            shift = (-(dy * W + dx)) % N
            shifted = pltpu.roll(x, shift=shift, axis=1) if shift else x
            valid = ((yy + dy >= 0) & (yy + dy < H) &
                     (xx + dx >= 0) & (xx + dx < W))
            tap = jnp.where(valid, shifted, 0.0)
            feat = feat + jnp.dot(w_ref[t], tap,
                                  preferred_element_type=jnp.float32)

        # Orthogonal transform multiply + per-image spatial mean.
        m = feat * tw_ref[...]                                        # (C, N)
        img = lax.broadcasted_iota(jnp.int32, (N, NB), 0) // HW
        col = lax.broadcasted_iota(jnp.int32, (N, NB), 1)
        seg = jnp.where(img == col, 1.0 / HW, 0.0).astype(jnp.float32)
        pred = jnp.dot(m, seg, preferred_element_type=jnp.float32)    # (C, NB)
        pred = pred + bf_ref[...]                                     # folded bias
        out_ref[0, :, :] = pred                                       # one store

    return kernel


def _pick_images_per_block(B, HW):
    """Smallest divisor nb of B such that nb*HW lanes is a multiple of 128."""
    for nb in range(1, B + 1):
        if B % nb == 0 and (nb * HW) % 128 == 0:
            return nb
    return B  # fallback: one block = whole batch (full-array exemption)


@functools.partial(jax.jit, static_argnames=("C", "H", "W", "NB"))
def _code_reduction_forward(x, w_taps, tw_tiled, bias_fold, *, C, H, W, NB):
    B = x.shape[0]
    HW = H * W
    nblk = B // NB
    # Channel-major, images packed along lanes: (C, B*HW). Only x-sized layout prep.
    x2d = jnp.transpose(x, (1, 0, 2, 3)).reshape(C, B * HW)

    out = pl.pallas_call(
        _make_fwd_kernel(C, H, W, NB),
        out_shape=jax.ShapeDtypeStruct((nblk, C, NB), jnp.float32),
        grid_spec=pltpu.PrefetchScalarGridSpec(
            num_scalar_prefetch=0,
            grid=(nblk,),
            in_specs=[
                pl.BlockSpec((C, NB * HW), lambda i: (0, i)),      # x2d
                pl.BlockSpec((9, C, C), lambda i: (0, 0, 0)),      # w_taps
                pl.BlockSpec((C, NB * HW), lambda i: (0, 0)),      # tw_tiled
                pl.BlockSpec((C, 1), lambda i: (0, 0)),            # bias_fold
            ],
            out_specs=pl.BlockSpec((1, C, NB), lambda i: (i, 0, 0)),
        ),
        compiler_params=pltpu.CompilerParams(
            dimension_semantics=("parallel",)),   # megacore over image blocks
    )(x2d, w_taps, tw_tiled, bias_fold)

    # (nblk, C, NB) -> (B, C)
    return out.transpose(0, 2, 1).reshape(B, C)


# ----------------------------------------------------------------------------
# Fused cosine-similarity kernel (both weight-only losses in ONE launch).
# ----------------------------------------------------------------------------
def _dual_cos_kernel(wc_ref, wt_ref, oc_ref, ot_ref):
    def cos_mean(w):
        G = w.shape[0]
        ss = jnp.sum(w * w, axis=-1, keepdims=True)
        wn = w * lax.rsqrt(ss + 1e-12)                # rsqrt -> EUP, + tiny guard
        cm = lax.dot_general(wn, wn, (((1,), (1,)), ((), ())),
                             preferred_element_type=jnp.float32)   # (G, G)
        cm = cm * cm
        row = lax.broadcasted_iota(jnp.int32, (G, G), 0)
        col = lax.broadcasted_iota(jnp.int32, (G, G), 1)
        cm = jnp.where(row == col, 0.0, cm)           # fill_diagonal_(0)
        s = jnp.sum(cm, axis=1, keepdims=True)
        s = jnp.sum(s, axis=0, keepdims=True)         # (1, 1)
        return s / (G * G)

    oc_ref[...] = cos_mean(wc_ref[...])
    ot_ref[...] = cos_mean(wt_ref[...])


# ----------------------------------------------------------------------------
# Module wrapper
# ----------------------------------------------------------------------------
class CodeReduction:
    """JAX/Pallas port of the PyTorch CodeReduction forward pass.

    Returns (pred_c [B, C], loss_conv, loss_trans).
    """

    def __init__(self, c_dim, feat_hw, blocks=4, prob=False, key=None):
        if prob:
            c_dim *= 2
        assert c_dim % blocks == 0
        self.c_dim, self.feat_hw, self.blocks = c_dim, feat_hw, blocks
        cg = c_dim // blocks
        k0, k1, k2 = jax.random.split(key, 3)
        # nn.Conv2d(c_dim, c_dim, 3, 1, 1, groups=blocks): weight (O, I/g, 3, 3)
        self.conv_w = 0.1 * jax.random.normal(k0, (c_dim, cg, 3, 3), jnp.float32)
        self.conv_b = 0.1 * jax.random.normal(k1, (c_dim,), jnp.float32)
        # OrthorTransform: torch.randn(1, c_dim, feat_hw, feat_hw)
        self.trans_w = jax.random.normal(k2, (1, c_dim, feat_hw, feat_hw),
                                         jnp.float32)

        # ---- one-time weight prep (hoisted out of the per-call path) ----
        C, G = c_dim, blocks
        HW = feat_hw * feat_hw
        cw = np.asarray(self.conv_w)
        w_taps = np.zeros((9, C, C), np.float32)   # per-tap block-diagonal weight
        for g in range(G):
            sl = slice(g * cg, (g + 1) * cg)
            for ky in range(3):
                for kx in range(3):
                    w_taps[ky * 3 + kx, sl, sl] = cw[sl, :, ky, kx]
        self.w_taps = jnp.asarray(w_taps)

        tw = self.trans_w.reshape(C, HW)
        self.tw = tw
        # bias folded through the spatial mean: mean((Wx+b)*t) = mean(Wx*t)+b*mean(t)
        self.bias_fold = self.conv_b.reshape(C, 1) * jnp.mean(tw, axis=1,
                                                              keepdims=True)
        self._tw_tiled = {}   # cache: images-per-block -> tiled transform weight

        # ---- weight-only cosine losses: one fused launch, computed once ----
        lc, lt = pl.pallas_call(
            _dual_cos_kernel,
            out_shape=(jax.ShapeDtypeStruct((1, 1), jnp.float32),
                       jax.ShapeDtypeStruct((1, 1), jnp.float32)),
            in_specs=[pl.BlockSpec(memory_space=pltpu.MemorySpace.VMEM)] * 2,
            out_specs=(pl.BlockSpec(memory_space=pltpu.MemorySpace.VMEM),
                       pl.BlockSpec(memory_space=pltpu.MemorySpace.VMEM)),
        )(self.conv_w.reshape(G, -1), self.trans_w.reshape(G, -1))
        self.loss_conv = lc[0, 0]
        self.loss_trans = lt[0, 0]

    def __call__(self, x):
        B, C, H, W = x.shape
        assert C == self.c_dim and H == self.feat_hw and W == self.feat_hw
        HW = H * W
        NB = _pick_images_per_block(B, HW)
        if NB not in self._tw_tiled:
            self._tw_tiled[NB] = jnp.tile(self.tw, (1, NB))
        pred_c = _code_reduction_forward(
            x, self.w_taps, self._tw_tiled[NB], self.bias_fold,
            C=C, H=H, W=W, NB=NB)
        return pred_c, self.loss_conv, self.loss_trans


# ----------------------------------------------------------------------------
# Pure-JAX reference (quiet correctness check)
# ----------------------------------------------------------------------------
def _reference(mod, x):
    conv = lax.conv_general_dilated(
        x, mod.conv_w, window_strides=(1, 1), padding=((1, 1), (1, 1)),
        dimension_numbers=("NCHW", "OIHW", "NCHW"),
        feature_group_count=mod.blocks) + mod.conv_b.reshape(1, -1, 1, 1)
    pred = (conv * mod.trans_w).mean(-1).mean(-1)

    def cos_sim(w):
        wn = w / jnp.linalg.norm(w, axis=-1, keepdims=True)
        cm = (wn @ wn.T) ** 2
        cm = cm * (1.0 - jnp.eye(w.shape[0]))
        return cm.mean()

    return (pred.reshape(x.shape[0], -1),
            cos_sim(mod.conv_w.reshape(mod.blocks, -1)),
            cos_sim(mod.trans_w.reshape(mod.blocks, -1)))


if __name__ == "__main__":
    key = jax.random.PRNGKey(0)
    k_param, k_x = jax.random.split(key)

    # batch, c_dim, feat_hw, blocks  (B=4 -> 2 image blocks of 128 lanes each)
    B, C, HW_SIDE, BLOCKS = 4, 8, 8, 4
    mod = CodeReduction(c_dim=C, feat_hw=HW_SIDE, blocks=BLOCKS, prob=False,
                        key=k_param)
    x = jax.random.normal(k_x, (B, C, HW_SIDE, HW_SIDE), jnp.float32)

    pred_c, loss_conv, loss_trans = mod(x)
    jax.block_until_ready((pred_c, loss_conv, loss_trans))

    ref_pred, ref_lc, ref_lt = _reference(mod, x)
    np.testing.assert_allclose(np.asarray(pred_c), np.asarray(ref_pred),
                               rtol=1e-4, atol=1e-5)
    np.testing.assert_allclose(float(loss_conv), float(ref_lc),
                               rtol=1e-4, atol=1e-6)
    np.testing.assert_allclose(float(loss_trans), float(ref_lt),
                               rtol=1e-4, atol=1e-6)

    print("KERNEL_OK")
</pallas_src>

<mosaic_0001>
module attributes {stable_mosaic.version = 11 : i64} {
  func.func @_dual_cos_kernel(%arg0: memref<4x36xf32, #tpu.memory_space<vmem>>, %arg1: memref<4x128xf32, #tpu.memory_space<vmem>>, %arg2: memref<1x1xf32, #tpu.memory_space<vmem>>, %arg3: memref<1x1xf32, #tpu.memory_space<vmem>>) attributes {dimension_semantics = [], scalar_prefetch = 0 : i64, scratch_operands = 0 : i64, tpu.core_type = #tpu.core_type<tc>} {
    %c0 = arith.constant 0 : index
    %c0_0 = arith.constant 0 : index
    %0 = vector.load %arg0[%c0, %c0_0] : memref<4x36xf32, #tpu.memory_space<vmem>>, vector<4x36xf32>
    %1 = arith.mulf %0, %0 : vector<4x36xf32>
    %cst = arith.constant dense<0.000000e+00> : vector<4xf32>
    %2 = vector.multi_reduction <add>, %1, %cst [1] : vector<4x36xf32> to vector<4xf32>
    %3 = vector.shape_cast %2 : vector<4xf32> to vector<4x1xf32>
    %cst_1 = arith.constant 9.99999996E-13 : f32
    %4 = vector.broadcast %cst_1 : f32 to vector<4x1xf32>
    %5 = arith.addf %3, %4 : vector<4x1xf32>
    %6 = math.rsqrt %5 : vector<4x1xf32>
    %7 = vector.broadcast %6 : vector<4x1xf32> to vector<4x36xf32>
    %8 = arith.mulf %0, %7 : vector<4x36xf32>
    %cst_2 = arith.constant dense<0.000000e+00> : vector<4x4xf32>
    %9 = tpu.matmul %8, %8, %cst_2 {dimension_numbers = #tpu.dot_dimension_numbers<[1], [1], [0], [0], [0, 0, 1, 0], [], []>} : vector<4x36xf32>, vector<4x36xf32>, vector<4x4xf32> -> vector<4x4xf32>
    %10 = arith.mulf %9, %9 : vector<4x4xf32>
    %11 = tpu.iota {dimensions = array<i32: 0>} : vector<4x4xi32>
    %12 = tpu.iota {dimensions = array<i32: 1>} : vector<4x4xi32>
    %13 = arith.cmpi eq, %11, %12 : vector<4x4xi32>
    %cst_3 = arith.constant 0.000000e+00 : f32
    %14 = vector.broadcast %cst_3 : f32 to vector<4x4xf32>
    %15 = arith.select %13, %14, %10 : vector<4x4xi1>, vector<4x4xf32>
    %cst_4 = arith.constant dense<0.000000e+00> : vector<4xf32>
    %16 = vector.multi_reduction <add>, %15, %cst_4 [1] : vector<4x4xf32> to vector<4xf32>
    %17 = vector.shape_cast %16 : vector<4xf32> to vector<4x1xf32>
    %cst_5 = arith.constant dense<0.000000e+00> : vector<1xf32>
    %18 = vector.multi_reduction <add>, %17, %cst_5 [0] : vector<4x1xf32> to vector<1xf32>
    %19 = vector.shape_cast %18 : vector<1xf32> to vector<1x1xf32>
    %cst_6 = arith.constant 1.600000e+01 : f32
    %20 = vector.broadcast %cst_6 : f32 to vector<1x1xf32>
    %21 = arith.divf %19, %20 : vector<1x1xf32>
    %c0_7 = arith.constant 0 : index
    %c0_8 = arith.constant 0 : index
    %22 = vector.load %arg2[%c0_7, %c0_8] : memref<1x1xf32, #tpu.memory_space<vmem>>, vector<1x1xf32>
    tpu.vector_store %arg2[%c0_7, %c0_8], %21 {strides = array<i32>} : memref<1x1xf32, #tpu.memory_space<vmem>>, vector<1x1xf32>,
    %c0_9 = arith.constant 0 : index
    %c0_10 = arith.constant 0 : index
    %23 = vector.load %arg1[%c0_9, %c0_10] : memref<4x128xf32, #tpu.memory_space<vmem>>, vector<4x128xf32>
    %24 = arith.mulf %23, %23 : vector<4x128xf32>
    %cst_11 = arith.constant dense<0.000000e+00> : vector<4xf32>
    %25 = vector.multi_reduction <add>, %24, %cst_11 [1] : vector<4x128xf32> to vector<4xf32>
    %26 = vector.shape_cast %25 : vector<4xf32> to vector<4x1xf32>
    %cst_12 = arith.constant 9.99999996E-13 : f32
    %27 = vector.broadcast %cst_12 : f32 to vector<4x1xf32>
    %28 = arith.addf %26, %27 : vector<4x1xf32>
    %29 = math.rsqrt %28 : vector<4x1xf32>
    %30 = vector.broadcast %29 : vector<4x1xf32> to vector<4x128xf32>
    %31 = arith.mulf %23, %30 : vector<4x128xf32>
    %cst_13 = arith.constant dense<0.000000e+00> : vector<4x4xf32>
    %32 = tpu.matmul %31, %31, %cst_13 {dimension_numbers = #tpu.dot_dimension_numbers<[1], [1], [0], [0], [0, 0, 1, 0], [], []>} : vector<4x128xf32>, vector<4x128xf32>, vector<4x4xf32> -> vector<4x4xf32>
    %33 = arith.mulf %32, %32 : vector<4x4xf32>
    %34 = tpu.iota {dimensions = array<i32: 0>} : vector<4x4xi32>
    %35 = tpu.iota {dimensions = array<i32: 1>} : vector<4x4xi32>
    %36 = arith.cmpi eq, %34, %35 : vector<4x4xi32>
    %cst_14 = arith.constant 0.000000e+00 : f32
    %37 = vector.broadcast %cst_14 : f32 to vector<4x4xf32>
    %38 = arith.select %36, %37, %33 : vector<4x4xi1>, vector<4x4xf32>
    %cst_15 = arith.constant dense<0.000000e+00> : vector<4xf32>
    %39 = vector.multi_reduction <add>, %38, %cst_15 [1] : vector<4x4xf32> to vector<4xf32>
    %40 = vector.shape_cast %39 : vector<4xf32> to vector<4x1xf32>
    %cst_16 = arith.constant dense<0.000000e+00> : vector<1xf32>
    %41 = vector.multi_reduction <add>, %40, %cst_16 [0] : vector<4x1xf32> to vector<1xf32>
    %42 = vector.shape_cast %41 : vector<1xf32> to vector<1x1xf32>
    %cst_17 = arith.constant 1.600000e+01 : f32
    %43 = vector.broadcast %cst_17 : f32 to vector<1x1xf32>
    %44 = arith.divf %42, %43 : vector<1x1xf32>
    %c0_18 = arith.constant 0 : index
    %c0_19 = arith.constant 0 : index
    %45 = vector.load %arg3[%c0_18, %c0_19] : memref<1x1xf32, #tpu.memory_space<vmem>>, vector<1x1xf32>
    tpu.vector_store %arg3[%c0_18, %c0_19], %44 {strides = array<i32>} : memref<1x1xf32, #tpu.memory_space<vmem>>, vector<1x1xf32>,
    return
  }
}

</mosaic_0001>

<bundles_post_ra>
// kernel: tpu_custom_call.1
= control target key start
LH: loop header
LB: loop body
LE: loop exit
PB: predicated region body
PF: predicated region fallthrough
CT: control target
= control target key end

     0   :  { %9 = vsyncpa [#allocation3], 0  ;;  %s468_s0 = inlined_call_operand.hbm [shape: f32[4,36], index: 0, kind: input, shape index: {}]   ;;  %s469_s1 = inlined_call_operand.hbm [shape: f32[4,128], index: 1, kind: input, shape index: {}]   ;;  %s470_s2 = inlined_call_operand.hbm [shape: f32[1,1], index: 2, kind: output, shape index: {0}]   ;;  %s471_s3 = inlined_call_operand.hbm [shape: f32[1,1], index: 3, kind: output, shape index: {1}]  }
   0x1   :  { %10 = vsyncpa [#allocation6], 0 }
   0x2   :  { %11 = vsyncpa [#allocation4], 0 }
   0x3   :  { %12 = vsyncpa [#allocation9], 0  ;;  %s389_s12 = smov [#allocation2]   ;;  %s390_s14 = smov [#allocation5]  }
   0x4   :  { %s19_s13 = sshll.u32 %s389_s12, 4  ;;  %s29_s15 = sshll.u32 %s390_s14, 4  ;;  %s20_s13 = int_to_ptr.vmem [resolvable:$true] %s19_s13  ;;  %s30_s15 = int_to_ptr.vmem [resolvable:$true] %s29_s15 }
   0x5   :  { %s293_s18 = scalar_lea.hbm %s468_s0, 64 }
   0x6   :  { %p294_p0 = scmp.ne.s32.totalorder %s468_s0, %s293_s18  ;;  %p297_p1 = scmp.lt.u32.totalorder %s293_s18, %s468_s0 }
   0x8   :  { %p299_p2 = pnand %p297_p1, %p294_p0 }
   0xa   :  { %302 = shalt.err (!%p299_p2)
}
   0xb   :  { %s303_s23 = scalar_lea.vmem %s20_s13, 64  ;;  %p308_p4 = scmp.lt.s32.totalorder %s20_s13, %s20_s13 }
   0xc   :  { %p304_p3 = scmp.ne.s32.totalorder %s20_s13, %s303_s23  ;;  %p309_p5 = scmp.lt.s32.totalorder %s303_s23, %s303_s23 }
   0xe   :  { %p310_p6 = por %p309_p5, %p308_p4 }
  0x10   :  { %p311_p7 = pnand %p310_p6, %p304_p3 }
  0x12   :  { %314 = shalt.err (!%p311_p7)
}
  0x13   :  { %22 = dma.hbm_to_vmem [thread:$0]  %s468_s0, 64, %s20_s13, [#allocation3]  }
  0x14   :  { %s315_s28 = scalar_lea.hbm %s469_s1, 64 }
  0x15   :  { %p316_p8 = scmp.ne.s32.totalorder %s469_s1, %s315_s28  ;;  %p319_p9 = scmp.lt.u32.totalorder %s315_s28, %s469_s1 }
  0x17   :  { %p321_p10 = pnand %p319_p9, %p316_p8 }
  0x19   :  { %324 = shalt.err (!%p321_p10)
}
  0x1a   :  { %s325_s6 = scalar_lea.vmem %s30_s15, 64  ;;  %p330_p12 = scmp.lt.s32.totalorder %s30_s15, %s30_s15 }
  0x1b   :  { %p326_p11 = scmp.ne.s32.totalorder %s30_s15, %s325_s6  ;;  %p331_p13 = scmp.lt.s32.totalorder %s325_s6, %s325_s6 }
  0x1d   :  { %p332_p0 = por %p331_p13, %p330_p12 }
  0x1f   :  { %p333_p1 = pnand %p332_p0, %p326_p11 }
  0x21   :  { %336 = shalt.err (!%p333_p1)
}
  0x22   :  { %32 = dma.hbm_to_vmem [thread:$0]  %s469_s1, 64, %s30_s15, [#allocation6]  }
  0x23   :  { %381 = dma.done.wait [#allocation3], 64  }
  0x24   :  { %382 = vsyncadd [#allocation3], 4294967232 }
  0x25   :  { %383 = dma.done.wait [#allocation6], 64  }
  0x26   :  { %384 = vsyncadd [#allocation6], 4294967232  ;;  %v39_v0 = vld [vmem:[#allocation2] sm:$0xf]  ;;  %vm41_vm0 = vcmask 289792   ;;  %vm133_vm1 = vcmask 1043456   ;;  %v123_v15 = vlaneseq }
  0x27   :  { %v145_v1 = vld [vmem:[#allocation5] sm:$0xf]  ;;  %v40_v2 = vmul.f32 %v39_v0, %v39_v0  ;;  %v391_v6 = vmov 0.0   ;;  %vm392_vm2 = vmmov 0   ;;  %vm48_vm3 = vcmask 293888   ;;  %s393_s1 = smov [#allocation7]  }
  0x28   :  { %v146_v3 = vmul.f32 %v145_v1, %v145_v1  ;;  %273 = vmatprep.subr.mxu0 %v391_v6  ;;  %278 = vmatprep.subr.mxu1 %v391_v6  ;;  %v124_v16 = vshrl.u32 %v123_v15, 7  ;;  %v126_v17 = vand.u32 127, %v123_v15  ;;  %vm129_vm5 = vcmask 27648   ;;  %s243_s8 = sshll.u32 %s393_s1, 4  ;;  %s394_s9 = smov [#allocation8]   ;;  %s244_s8 = int_to_ptr.vmem [resolvable:$true] %s243_s8 }
  0x29   :  { %v42_v4 = vsel %vm41_vm0, %v40_v2, 0.0  ;;  %275 = vmatprep.mubr.msk.f32.mxu0 %vm392_vm2, %v391_v6  ;;  %280 = vmatprep.mubr.msk.f32.mxu1 %vm392_vm2, %v391_v6  ;;  %vm143_vm6 = vcmask 0   ;;  %s253_s10 = sshll.u32 %s394_s9, 4  ;;  %s337_s11 = scalar_lea.vmem %s244_s8, 16  ;;  %s254_s10 = int_to_ptr.vmem [resolvable:$true] %s253_s10 }
  0x2a   :  { %43 = vadd.xlane.f32.xlu0 %v42_v4  ;;  %v147_v5 = vsel %vm133_vm1, %v146_v3, 0.0  ;;  %vm127_vm4 = vcmp.eq.s32.totalorder %v124_v16, %v126_v17  ;;  %p338_p2 = scmp.ne.s32.totalorder %s244_s8, %s337_s11  ;;  %s341_s12 = scalar_lea.vmem %s244_s8, 32 }
  0x2b   :  { %p342_p3 = scmp.lt.s32.totalorder %s244_s8, %s244_s8  ;;  %p343_p4 = scmp.lt.s32.totalorder %s341_s12, %s337_s11 }
  0x2d   :  { %p344_p5 = por %p343_p4, %p342_p3 }
  0x2e   :  { %148 = vadd.xlane.f32.xlu0 %v147_v5 }
  0x2f   :  { %p345_p6 = pnand %p344_p5, %p338_p2 }
  0xb7   :  { %v44_v7 = vpop.xlane.xlu0 %43 }
  0xb8   :  { %v45_v8 = vadd.f32 1e-12, %v44_v7 }
  0xba   :  { %289 = vrsqrt.f32 %v45_v8 }
  0xbb   :  { %v149_v9 = vpop.xlane.xlu0 %148 }
  0xbc   :  { %v150_v10 = vadd.f32 1e-12, %v149_v9 }
  0xbe   :  { %291 = vrsqrt.f32 %v150_v10 }
  0xc4   :  { %v290_v11 = vpop.eup %289 }
  0xc5   :  { %v47_v12 = vmul.f32 %v290_v11, %v39_v0 }
  0xc7   :  { %274 = vmatpush3.xpose.msk.msra.mxu0 %vm48_vm3, %v47_v12 }
  0xc8   :  { %v292_v13 = vpop.eup %291 }
  0xc9   :  { %v152_v14 = vmul.f32 %v292_v13, %v145_v1 }
  0xca   :  { %276 = vmatmul.mubr.msk.f32.vlgmr.msra.gmra.mrb[0].mxu0 %vm48_vm3, %v47_v12 }
  0xcb   :  { %279 = vmatpush3.xpose.msra.mxu1 %v152_v14 }
  0xce   :  { %281 = vmatmul.mubr.f32.vlgmr.msra.gmra.mrb[0].mxu1 %v152_v14 }
 0x19d   :  { %v118_v18 = vpop.f32.mrb[0].mxu0 }
 0x19e   :  { %v122_v19 = vmul.f32 %v118_v18, %v118_v18  ;;  %v277_v20 = vpop.f32.mrb[1].mxu0 }
 0x1a0   :  { %v128_v21 = vsel %vm127_vm4, 0.0, %v122_v19 }
 0x1a1   :  { %v219_v22 = vpop.f32.mrb[0].mxu1  ;;  %v130_v23 = vsel %vm129_vm5, %v128_v21, 0.0 }
 0x1a2   :  { %v223_v24 = vmul.f32 %v219_v22, %v219_v22  ;;  %131 = vadd.xlane.f32.xlu1 %v130_v23  ;;  %v282_v25 = vpop.f32.mrb[1].mxu1 }
 0x1a4   :  { %v224_v26 = vsel %vm127_vm4, 0.0, %v223_v24 }
 0x1a5   :  { %v225_v27 = vsel %vm129_vm5, %v224_v26, 0.0 }
 0x1a6   :  { %226 = vadd.xlane.f32.xlu1 %v225_v27 }
 0x22f   :  { %v132_v28 = vpop.xlane.xlu1 %131 }
 0x230   :  { %v134_v29 = vsel %vm133_vm1, %v132_v28, 0.0 }
 0x231   :  { %v135_v30 = vrot.slane %v134_v29, 4 }
 0x233   :  { %v136_v31 = vadd.f32 %v135_v30, %v134_v29  ;;  %v227_v32 = vpop.xlane.xlu1 %226 }
 0x234   :  { %v228_v33 = vsel %vm133_vm1, %v227_v32, 0.0 }
 0x235   :  { %v137_v34 = vrot.slane %v136_v31, 2  ;;  %v229_v35 = vrot.slane %v228_v33, 4 }
 0x237   :  { %v138_v36 = vadd.f32 %v137_v34, %v136_v31  ;;  %v230_v37 = vadd.f32 %v229_v35, %v228_v33 }
 0x239   :  { %v139_v38 = vrot.slane %v138_v36, 1  ;;  %v231_v39 = vrot.slane %v230_v37, 2 }
 0x23b   :  { %v140_v40 = vadd.f32 %v139_v38, %v138_v36  ;;  %v232_v41 = vadd.f32 %v231_v39, %v230_v37 }
 0x23d   :  { %v142_v42 = vmul.f32 0.0625, %v140_v40  ;;  %v233_v43 = vrot.slane %v232_v41, 1 }
 0x23f   :  { %v234_v44 = vadd.f32 %v233_v43, %v232_v41  ;;  %144 = vst.msk [vmem:[#allocation7] sm:$0x1] %vm143_vm6, %v142_v42 }
 0x240   :  { %348 = shalt.err (!%p345_p6)
}
 0x241   :  { %s349_s15 = scalar_lea.hbm %s470_s2, 16 }
 0x242   :  { %p350_p7 = scmp.ne.s32.totalorder %s470_s2, %s349_s15  ;;  %p353_p8 = scmp.lt.u32.totalorder %s349_s15, %s470_s2 }
 0x244   :  { %p355_p9 = pnand %p353_p8, %p350_p7 }
 0x246   :  { %358 = shalt.err (!%p355_p9)
}
 0x247   :  { %246 = dma.vmem_to_hbm [thread:$0]  %s244_s8, 16, %s470_s2, [#allocation4]   ;;  %v235_v45 = vmul.f32 0.0625, %v234_v44 }
 0x248   :  { %s359_s22 = scalar_lea.vmem %s254_s10, 16  ;;  %s363_s23 = scalar_lea.vmem %s254_s10, 32 }
 0x249   :  { %236 = vst.msk [vmem:[#allocation8] sm:$0x1] %vm143_vm6, %v235_v45  ;;  %p360_p10 = scmp.ne.s32.totalorder %s254_s10, %s359_s22  ;;  %p364_p11 = scmp.lt.s32.totalorder %s254_s10, %s254_s10 }
 0x24a   :  { %p365_p12 = scmp.lt.s32.totalorder %s363_s23, %s359_s22 }
 0x24c   :  { %p366_p13 = por %p365_p12, %p364_p11 }
 0x24e   :  { %p367_p0 = pnand %p366_p13, %p360_p10 }
 0x250   :  { %370 = shalt.err (!%p367_p0)
}
 0x251   :  { %s371_s26 = scalar_lea.hbm %s471_s3, 16 }
 0x252   :  { %p372_p1 = scmp.ne.s32.totalorder %s471_s3, %s371_s26  ;;  %p375_p2 = scmp.lt.u32.totalorder %s371_s26, %s471_s3 }
 0x254   :  { %p377_p3 = pnand %p375_p2, %p372_p1 }
 0x256   :  { %380 = shalt.err (!%p377_p3)
}
 0x257   :  { %256 = dma.vmem_to_hbm [thread:$0]  %s254_s10, 16, %s471_s3, [#allocation9]  }
 0x258   :  { %385 = dma.done.wait [#allocation4], 16  }
 0x259   :  { %386 = vsyncadd [#allocation4], 4294967280 }
 0x25a   :  { %387 = dma.done.wait [#allocation9], 16  }
 0x25b   :  { %388 = vsyncadd [#allocation9], 4294967280 }
 0x25c   :  { %263 = vsyncpa [#allocation3], 1 }
 0x25d   :  { %264 = vsyncpa [#allocation6], 1 }
 0x25e   :  { %265 = vsyncpa [#allocation4], 1 }
 0x25f   :  { %266 = vsyncpa [#allocation9], 1 }

</bundles_post_ra>
